<compile_context>
chip_gen: v5e
topology: v5e:2x2
jax: 0.10.0
libtpu: 0.0.40
codegen_flags: <defaults>
</compile_context>

<pallas_src>
import functools

import jax
import jax.numpy as jnp
from jax.experimental import pallas as pl
from jax.experimental.pallas import tpu as pltpu

_LN_EPS = 1e-5  # PyTorch nn.LayerNorm default


def _vmem_capacity_bytes():
    """Physical VMEM per TensorCore; conservative fallback if the query fails
    (e.g. interpret mode / CPU)."""
    try:
        cap = int(getattr(pltpu.get_tpu_info(), "vmem_capacity_bytes", 0))
        if cap > 0:
            return cap
    except Exception:
        pass
    return 64 << 20  # v7x per-TC VMEM (smallest of the supported generations)


def _pick_row_tile(rows, hidden, itemsize):
    """Largest row tile that (a) fits a generation-aware VMEM budget including
    in-kernel f32 intermediates, (b) keeps >= ~6 grid steps when rows allow
    (>= 3 per TensorCore on v7x), and (c) divides `rows` when that does not
    shrink the tile too much (avoids a ragged last block)."""
    pack = 8 * (4 // max(itemsize, 1))          # sublane packing: 8 f32, 16 bf16
    cap = _vmem_capacity_bytes()
    budget = (24 << 20) if cap <= (64 << 20) else (48 << 20)
    # Double-buffered x/y/q/out tiles plus the in-kernel f32 intermediates.
    per_row = 2 * 4 * hidden * itemsize + 2 * hidden * 4
    tile = max(budget // per_row, pack)
    tile = min(tile, 1024)
    tile = max((tile // pack) * pack, pack)
    # Keep >= ~6 grid steps when rows allow, so both v7x TensorCores get
    # multiple steps and DMA/compute/writeback overlap.
    min_steps = 6
    if rows >= min_steps * pack:
        tile = min(tile, max((rows // min_steps) // pack * pack, pack))
    if tile >= rows:
        return rows                              # single full-extent block
    # Prefer an exact divisor of rows (no ragged last block) if it stays large.
    if rows % pack == 0:
        t = tile
        while t >= pack and rows % t != 0:
            t -= pack
        if t >= pack and rows % t == 0 and 2 * t >= tile:
            return t
    return tile


def _lowbias32(v):
    """32-bit integer mixer (lowbias32) on uint32 values; pure VPU ops."""
    v = (v ^ (v >> jnp.uint32(16))) * jnp.uint32(0x7FEB352D)
    v = (v ^ (v >> jnp.uint32(15))) * jnp.uint32(0x846CA68B)
    v = v ^ (v >> jnp.uint32(16))
    return v


def _mul_module_kernel(seed_ref, x_ref, y_ref, q_ref, g_ref, b_ref, o_ref, *,
                       dropout_p: float, training: bool, row_tile: int,
                       hidden: int):
    # ---- hot path: elementwise mul, additive fusion, LayerNorm over H ----
    x = x_ref[...].astype(jnp.float32)
    y = y_ref[...].astype(jnp.float32)
    q = q_ref[...].astype(jnp.float32)

    z = x * y + q                                # x*y, then fusion_net(a, q) = a + q

    inv_h = jnp.float32(1.0 / hidden)
    mean = jnp.sum(z, axis=-1, keepdims=True) * inv_h
    zc = z - mean
    var = jnp.sum(zc * zc, axis=-1, keepdims=True) * inv_h   # two-pass: no cancellation
    inv = jax.lax.rsqrt(var + _LN_EPS)

    gamma = g_ref[...].astype(jnp.float32)
    beta = b_ref[...].astype(jnp.float32)
    out = zc * (inv * gamma) + beta              # folded affine scale

    # ---- dropout: counter-based integer-hash mask (no hardware PRNG) ----
    if training and dropout_p > 0.0:
        if dropout_p >= 1.0:
            out = jnp.zeros_like(out)
        else:
            seed_i = seed_ref[0]                                  # int32 scalar
            base_row = pl.program_id(0) * row_tile                # int32 scalar
            r = jax.lax.broadcasted_iota(jnp.int32, out.shape, 0) + base_row
            c = jax.lax.broadcasted_iota(jnp.int32, out.shape, 1)
            # Global element index + seed offset (wrapping int32 arithmetic).
            cnt = r * hidden + c + seed_i * (-1640531527)         # 0x9E3779B9
            bits = _lowbias32(jax.lax.bitcast_convert_type(cnt, jnp.uint32))
            # Signed-safe threshold compare on the top 31 bits.
            bits31 = jax.lax.bitcast_convert_type(bits >> jnp.uint32(1), jnp.int32)
            thresh = jnp.int32(min(int(round(dropout_p * 2147483648.0)),
                                   2147483647))
            keep = bits31 >= thresh                               # P(drop) ~= p
            out = jnp.where(keep,
                            out * jnp.float32(1.0 / (1.0 - dropout_p)),
                            jnp.float32(0.0))

    o_ref[...] = out.astype(o_ref.dtype)


def mul_module_forward(x, y, q, gamma, beta, *, dropout_p=0.5, training=False,
                       seed=0, row_tile=None):
    """x, y, q: (B, S, H). gamma, beta: (H,). Returns (B, S, H)."""
    B, S, H = x.shape
    rows = B * S
    itemsize = jnp.dtype(x.dtype).itemsize

    if row_tile is None:
        row_tile = _pick_row_tile(rows, H, itemsize)
    row_tile = int(row_tile)
    grid_n = (rows + row_tile - 1) // row_tile

    # Free reshapes only -- no padding, no extra HBM traffic.
    x2 = x.reshape(rows, H)
    y2 = y.reshape(rows, H)
    q2 = q.reshape(rows, H)
    g2 = gamma.reshape(1, H)
    b2 = beta.reshape(1, H)
    seed_arr = jnp.asarray([seed], dtype=jnp.int32)

    kernel = functools.partial(_mul_module_kernel,
                               dropout_p=float(dropout_p),
                               training=bool(training),
                               row_tile=row_tile,
                               hidden=int(H))

    row_spec = pl.BlockSpec((row_tile, H), lambda i: (i, 0))
    par_spec = pl.BlockSpec((1, H), lambda i: (0, 0))

    # Explicit VMEM limit sized to the double-buffered working set plus the
    # f32 intermediates, capped per generation (64 MiB per TC on v7x).
    cap = _vmem_capacity_bytes()
    work_bytes = 2 * 4 * row_tile * H * itemsize + 2 * row_tile * H * 4 + 4 * H * 4
    vmem_limit = int(min(max(work_bytes + (8 << 20), 32 << 20), cap * 7 // 8))

    out2 = pl.pallas_call(
        kernel,
        out_shape=jax.ShapeDtypeStruct((rows, H), x.dtype),
        grid=(grid_n,),
        in_specs=[
            pl.BlockSpec(memory_space=pltpu.MemorySpace.SMEM),  # seed
            row_spec, row_spec, row_spec,                       # x, y, q
            par_spec, par_spec,                                 # gamma, beta
        ],
        out_specs=row_spec,
        compiler_params=pltpu.CompilerParams(
            dimension_semantics=("parallel",),
            vmem_limit_bytes=vmem_limit),
    )(seed_arr, x2, y2, q2, g2, b2)

    return out2.reshape(B, S, H)


def _reference(x, y, q, gamma, beta):
    z = x * y + q
    mean = jnp.mean(z, axis=-1, keepdims=True)
    var = jnp.mean((z - mean) ** 2, axis=-1, keepdims=True)
    return (z - mean) * jax.lax.rsqrt(var + _LN_EPS) * gamma + beta


if __name__ == "__main__":
    B, S, H = 2, 8, 128
    key = jax.random.PRNGKey(0)
    kx, ky, kq = jax.random.split(key, 3)

    x = jax.random.normal(kx, (B, S, H), dtype=jnp.float32)
    y = jax.random.normal(ky, (B, S, H), dtype=jnp.float32)
    q = jax.random.normal(kq, (B, S, H), dtype=jnp.float32)

    # Deterministic LayerNorm parameters (perturbed so the affine is exercised).
    gamma = jnp.ones((H,), jnp.float32) + 0.01 * jnp.arange(H, dtype=jnp.float32) / H
    beta = 0.05 * jnp.cos(jnp.arange(H, dtype=jnp.float32))

    # Eval mode (dropout is identity) -> deterministic, check against plain JAX.
    out = mul_module_forward(x, y, q, gamma, beta, dropout_p=0.5, training=False)
    jax.block_until_ready(out)
    ref = _reference(x, y, q, gamma, beta)
    assert jnp.allclose(out, ref, atol=1e-5, rtol=1e-5), "mismatch vs reference"

    # Unaligned shape: H not a multiple of 128, rows not a multiple of 8.
    B2, S2, H2 = 3, 5, 96
    k2x, k2y, k2q = jax.random.split(jax.random.PRNGKey(1), 3)
    x2 = jax.random.normal(k2x, (B2, S2, H2), dtype=jnp.float32)
    y2 = jax.random.normal(k2y, (B2, S2, H2), dtype=jnp.float32)
    q2 = jax.random.normal(k2q, (B2, S2, H2), dtype=jnp.float32)
    g2 = jnp.ones((H2,), jnp.float32)
    b2 = jnp.zeros((H2,), jnp.float32)
    out_u = mul_module_forward(x2, y2, q2, g2, b2, dropout_p=0.5, training=False)
    jax.block_until_ready(out_u)
    ref_u = _reference(x2, y2, q2, g2, b2)
    assert jnp.allclose(out_u, ref_u, atol=1e-5, rtol=1e-5), "unaligned mismatch"

    # Training-mode dropout (counter-based hash mask; tile-independent).
    out_tr = mul_module_forward(x, y, q, gamma, beta, dropout_p=0.5,
                                training=True, seed=123)
    jax.block_until_ready(out_tr)
    kept = out_tr != 0.0
    frac = float(jnp.mean(kept.astype(jnp.float32)))
    assert 0.35 < frac < 0.65, f"dropout keep fraction off: {frac}"
    assert jnp.allclose(jnp.where(kept, out_tr, 0.0),
                        jnp.where(kept, 2.0 * out, 0.0),
                        atol=1e-5, rtol=1e-5), "dropout rescale mismatch"

    print("KERNEL_OK")
</pallas_src>

<mosaic_0001>
module attributes {stable_mosaic.version = 11 : i64} {
  func.func @_mul_module_kernel(%arg0: i32, %arg1: memref<1xi32, #tpu.memory_space<smem>>, %arg2: memref<16x128xf32, #tpu.memory_space<vmem>>, %arg3: memref<16x128xf32, #tpu.memory_space<vmem>>, %arg4: memref<16x128xf32, #tpu.memory_space<vmem>>, %arg5: memref<1x128xf32, #tpu.memory_space<vmem>>, %arg6: memref<1x128xf32, #tpu.memory_space<vmem>>, %arg7: memref<16x128xf32, #tpu.memory_space<vmem>>) attributes {dimension_semantics = [#tpu.dimension_semantics<parallel>], iteration_bounds = array<i64: 1>, scalar_prefetch = 0 : i64, scratch_operands = 0 : i64, tpu.core_type = #tpu.core_type<tc>, window_params = [{transform_indices = @transform_0, window_bounds = array<i64: 1>}, {transform_indices = @transform_1, window_bounds = array<i64: 16, 128>}, {transform_indices = @transform_2, window_bounds = array<i64: 16, 128>}, {transform_indices = @transform_3, window_bounds = array<i64: 16, 128>}, {pipeline_mode = #tpu.pipeline_mode<synchronous>, transform_indices = @transform_4, window_bounds = array<i64: 1, 128>}, {pipeline_mode = #tpu.pipeline_mode<synchronous>, transform_indices = @transform_5, window_bounds = array<i64: 1, 128>}, {transform_indices = @transform_6, window_bounds = array<i64: 16, 128>}]} {
    %c0 = arith.constant 0 : index
    %c0_0 = arith.constant 0 : index
    %0 = vector.load %arg2[%c0, %c0_0] : memref<16x128xf32, #tpu.memory_space<vmem>>, vector<16x128xf32>
    %c0_1 = arith.constant 0 : index
    %c0_2 = arith.constant 0 : index
    %1 = vector.load %arg3[%c0_1, %c0_2] : memref<16x128xf32, #tpu.memory_space<vmem>>, vector<16x128xf32>
    %c0_3 = arith.constant 0 : index
    %c0_4 = arith.constant 0 : index
    %2 = vector.load %arg4[%c0_3, %c0_4] : memref<16x128xf32, #tpu.memory_space<vmem>>, vector<16x128xf32>
    %3 = arith.mulf %0, %1 : vector<16x128xf32>
    %4 = arith.addf %3, %2 : vector<16x128xf32>
    %cst = arith.constant dense<0.000000e+00> : vector<16xf32>
    %5 = vector.multi_reduction <add>, %4, %cst [1] : vector<16x128xf32> to vector<16xf32>
    %6 = vector.shape_cast %5 : vector<16xf32> to vector<16x1xf32>
    %cst_5 = arith.constant 7.812500e-03 : f32
    %7 = vector.broadcast %cst_5 : f32 to vector<16x1xf32>
    %8 = arith.mulf %6, %7 : vector<16x1xf32>
    %9 = vector.broadcast %8 : vector<16x1xf32> to vector<16x128xf32>
    %10 = arith.subf %4, %9 : vector<16x128xf32>
    %11 = arith.mulf %10, %10 : vector<16x128xf32>
    %cst_6 = arith.constant dense<0.000000e+00> : vector<16xf32>
    %12 = vector.multi_reduction <add>, %11, %cst_6 [1] : vector<16x128xf32> to vector<16xf32>
    %13 = vector.shape_cast %12 : vector<16xf32> to vector<16x1xf32>
    %cst_7 = arith.constant 7.812500e-03 : f32
    %14 = vector.broadcast %cst_7 : f32 to vector<16x1xf32>
    %15 = arith.mulf %13, %14 : vector<16x1xf32>
    %cst_8 = arith.constant 9.99999974E-6 : f32
    %16 = vector.broadcast %cst_8 : f32 to vector<16x1xf32>
    %17 = arith.addf %15, %16 : vector<16x1xf32>
    %18 = math.rsqrt %17 : vector<16x1xf32>
    %c0_9 = arith.constant 0 : index
    %c0_10 = arith.constant 0 : index
    %19 = vector.load %arg5[%c0_9, %c0_10] : memref<1x128xf32, #tpu.memory_space<vmem>>, vector<1x128xf32>
    %c0_11 = arith.constant 0 : index
    %c0_12 = arith.constant 0 : index
    %20 = vector.load %arg6[%c0_11, %c0_12] : memref<1x128xf32, #tpu.memory_space<vmem>>, vector<1x128xf32>
    %21 = vector.broadcast %18 : vector<16x1xf32> to vector<16x128xf32>
    %22 = vector.broadcast %19 : vector<1x128xf32> to vector<16x128xf32>
    %23 = arith.mulf %21, %22 : vector<16x128xf32>
    %24 = arith.mulf %10, %23 : vector<16x128xf32>
    %25 = vector.broadcast %20 : vector<1x128xf32> to vector<16x128xf32>
    %26 = arith.addf %24, %25 : vector<16x128xf32>
    %c0_13 = arith.constant 0 : index
    %c0_14 = arith.constant 0 : index
    %27 = vector.load %arg7[%c0_13, %c0_14] : memref<16x128xf32, #tpu.memory_space<vmem>>, vector<16x128xf32>
    tpu.vector_store %arg7[%c0_13, %c0_14], %26 {strides = array<i32>} : memref<16x128xf32, #tpu.memory_space<vmem>>, vector<16x128xf32>,
    return
  }
  func.func @transform_0(%arg0: i32) -> i32 {
    %c0_i32 = arith.constant 0 : i32
    %c0_i32_0 = arith.constant 0 : i32
    return %c0_i32 : i32
  }
  func.func @transform_1(%arg0: i32) -> (i32, i32) {
    %c0_i32 = arith.constant 0 : i32
    %c0_i32_0 = arith.constant 0 : i32
    return %arg0, %c0_i32 : i32, i32
  }
  func.func @transform_2(%arg0: i32) -> (i32, i32) {
    %c0_i32 = arith.constant 0 : i32
    %c0_i32_0 = arith.constant 0 : i32
    return %arg0, %c0_i32 : i32, i32
  }
  func.func @transform_3(%arg0: i32) -> (i32, i32) {
    %c0_i32 = arith.constant 0 : i32
    %c0_i32_0 = arith.constant 0 : i32
    return %arg0, %c0_i32 : i32, i32
  }
  func.func @transform_4(%arg0: i32) -> (i32, i32) {
    %c0_i32 = arith.constant 0 : i32
    %c0_i32_0 = arith.constant 0 : i32
    %c0_i32_1 = arith.constant 0 : i32
    return %c0_i32, %c0_i32_0 : i32, i32
  }
  func.func @transform_5(%arg0: i32) -> (i32, i32) {
    %c0_i32 = arith.constant 0 : i32
    %c0_i32_0 = arith.constant 0 : i32
    %c0_i32_1 = arith.constant 0 : i32
    return %c0_i32, %c0_i32_0 : i32, i32
  }
  func.func @transform_6(%arg0: i32) -> (i32, i32) {
    %c0_i32 = arith.constant 0 : i32
    %c0_i32_0 = arith.constant 0 : i32
    return %arg0, %c0_i32 : i32, i32
  }
}

</mosaic_0001>

<bundles_post_ra>
// kernel: tpu_custom_call.1
= control target key start
LH: loop header
LB: loop body
LE: loop exit
PB: predicated region body
PF: predicated region fallthrough
CT: control target
= control target key end

     0   :  { %12 = vsyncpa [#allocation4], 0  ;;  %s341_s0 = inlined_call_operand.<no memory space> [shape: s32[1], index: 0, kind: input, shape index: {}]   ;;  %s342_s1 = inlined_call_operand.hbm [shape: f32[16,128], index: 1, kind: input, shape index: {}]   ;;  %s343_s2 = inlined_call_operand.hbm [shape: f32[16,128], index: 2, kind: input, shape index: {}]   ;;  %s344_s3 = inlined_call_operand.hbm [shape: f32[16,128], index: 3, kind: input, shape index: {}]   ;;  %s345_s4 = inlined_call_operand.vmem [shape: f32[1,128], index: 4, kind: input, shape index: {}]   ;;  %s346_s5 = inlined_call_operand.vmem [shape: f32[1,128], index: 5, kind: input, shape index: {}]   ;;  %s347_s6 = inlined_call_operand.hbm [shape: f32[16,128], index: 6, kind: output, shape index: {}]  }
   0x1   :  { %13 = vsyncpa [#allocation7], 0 }
   0x2   :  { %14 = vsyncpa [#allocation5], 0  ;;  %s34_s22 = sshll.u32 %s343_s2, 4  ;;  %s270_s23 = smov [#allocation6]   ;;  %s35_s22 = int_to_ptr.hbm [resolvable:$true] %s34_s22 }
   0x3   :  { %s36_s24 = sshll.u32 %s270_s23, 4  ;;  %s21_s27 = sshll.u32 %s342_s1, 4  ;;  %s37_s24 = int_to_ptr.vmem [resolvable:$true] %s36_s24  ;;  %s22_s27 = int_to_ptr.hbm [resolvable:$true] %s21_s27 }
   0x4   :  { %s271_s28 = smov 128   ;;  %s272_s29 = smov 8  }
   0x5   :  { %42 = dma.hbm_to_vmem [thread:$0]  %s35_s22, 256, %s37_s24, [#allocation7], %s271_s28, %s271_s28, %s272_s29  }
   0x6   :  { %s273_s30 = smov [#allocation3]   ;;  %s47_s2 = sshll.u32 %s344_s3, 4  ;;  %s48_s2 = int_to_ptr.hbm [resolvable:$true] %s47_s2 }
   0x7   :  { %s23_s7 = sshll.u32 %s273_s30, 4  ;;  %s274_s1 = smov [#allocation8]   ;;  %s24_s7 = int_to_ptr.vmem [resolvable:$true] %s23_s7 }
   0x8   :  { %29 = dma.hbm_to_vmem [thread:$0]  %s22_s27, 256, %s24_s7, [#allocation4], %s271_s28, %s271_s28, %s272_s29  }
   0x9   :  { %s49_s10 = sshll.u32 %s274_s1, 4  ;;  %s50_s10 = int_to_ptr.vmem [resolvable:$true] %s49_s10 }
   0xa   :  { %55 = dma.hbm_to_vmem [thread:$0]  %s48_s2, 256, %s50_s10, [#allocation7], %s271_s28, %s271_s28, %s272_s29  }
   0xb   :  { %264 = dma.done.wait [#allocation4], 256  }
   0xc   :  { %265 = vsyncadd [#allocation4], 4294967040 }
   0xd   :  { %266 = dma.done.wait [#allocation7], 512  }
   0xe   :  { %267 = vsyncadd [#allocation7], 4294966784  ;;  %v72_v0 = vld [vmem:[#allocation3] sm:$0xff]  ;;  %v74_v1 = vld [vmem:[#allocation6] sm:$0xff]  ;;  %s142_s17 = sshll.u32 %s347_s6, 4  ;;  %s143_s17 = int_to_ptr.hbm [resolvable:$true] %s142_s17 }
   0xf   :  { %v76_v2 = vld [vmem:[#allocation8] sm:$0xff]  ;;  %v78_v3 = vmul.f32 %v74_v1, %v72_v0  ;;  %v73_v4 = vld [vmem:[#allocation3 + $0x8] sm:$0xff]  ;;  %v75_v5 = vld [vmem:[#allocation6 + $0x8] sm:$0xff] }
  0x10   :  { %v79_v7 = vmul.f32 %v75_v5, %v73_v4  ;;  %v77_v8 = vld [vmem:[#allocation8 + $0x8] sm:$0xff]  ;;  %v162_v30 = vld [vmem:[%s345_s4] ss:$0 sm:$0xff]  ;;  %s275_s4 = smov [#allocation9]  }
  0x11   :  { %v80_v6 = vadd.f32 %v78_v3, %v76_v2  ;;  %v163_v36 = vld [vmem:[%s346_s5] ss:$0 sm:$0xff]  ;;  %s140_s14 = sshll.u32 %s275_s4, 4  ;;  %s141_s14 = int_to_ptr.vmem [resolvable:$true] %s140_s14 }
  0x12   :  { %v81_v9 = vadd.f32 %v79_v7, %v77_v8 }
  0x13   :  { %82 = vadd.xlane.f32.xlu0 %v80_v6 }
  0x1b   :  { %84 = vadd.xlane.f32.xlu0 %v81_v9 }
  0x86   :  { %v83_v10 = vpop.xlane.xlu0 %82 }
  0x87   :  { %v86_v11 = vmul.f32 0.0078125, %v83_v10 }
  0x89   :  { %v88_v12 = vsub.f32 %v80_v6, %v86_v11 }
  0x8b   :  { %v90_v13 = vmul.f32 %v88_v12, %v88_v12 }
  0x8d   :  { %92 = vadd.xlane.f32.xlu1 %v90_v13 }
  0x8e   :  { %v85_v14 = vpop.xlane.xlu0 %84 }
  0x8f   :  { %v87_v15 = vmul.f32 0.0078125, %v85_v14 }
  0x91   :  { %v89_v16 = vsub.f32 %v81_v9, %v87_v15 }
  0x93   :  { %v91_v17 = vmul.f32 %v89_v16, %v89_v16 }
  0x95   :  { %94 = vadd.xlane.f32.xlu1 %v91_v17 }
 0x100   :  { %v93_v18 = vpop.xlane.xlu1 %92 }
 0x101   :  { %v96_v19 = vmul.f32 0.0078125, %v93_v18 }
 0x103   :  { %v98_v20 = vadd.f32 1e-05, %v96_v19 }
 0x105   :  { %164 = vrsqrt.f32 %v98_v20  ;;  %vm106_vm1 = vweird.f32 %v98_v20 }
 0x108   :  { %v95_v21 = vpop.xlane.xlu1 %94 }
 0x109   :  { %v97_v22 = vmul.f32 0.0078125, %v95_v21 }
 0x10b   :  { %v165_v23 = vpop.eup %164  ;;  %v99_v24 = vadd.f32 1e-05, %v97_v22 }
 0x10c   :  { %v101_v25 = vmul.f32 %v165_v23, %v98_v20  ;;  %vm107_vm0 = vweird.f32 %v165_v23 }
 0x10d   :  { %166 = vrsqrt.f32 %v99_v24  ;;  %vm108_vm2 = vmor %vm106_vm1, %vm107_vm0  ;;  %vm116_vm4 = vweird.f32 %v99_v24 }
 0x10e   :  { %v102_v26 = vmul.f32 %v165_v23, %v101_v25 }
 0x110   :  { %v103_v27 = vmul.f32 0.5, %v102_v26 }
 0x112   :  { %v104_v28 = vsub.f32 1.5, %v103_v27 }
 0x113   :  { %v167_v29 = vpop.eup %166 }
 0x114   :  { %v105_v31 = vmul.f32 %v165_v23, %v104_v28  ;;  %v111_v32 = vmul.f32 %v167_v29, %v99_v24  ;;  %vm117_vm3 = vweird.f32 %v167_v29 }
 0x115   :  { %vm118_vm5 = vmor %vm116_vm4, %vm117_vm3 }
 0x116   :  { %v109_v33 = vsel %vm108_vm2, %v165_v23, %v105_v31  ;;  %v112_v34 = vmul.f32 %v167_v29, %v111_v32 }
 0x117   :  { %v125_v35 = vmul.f32 %v162_v30, %v109_v33 }
 0x118   :  { %v113_v37 = vmul.f32 0.5, %v112_v34 }
 0x119   :  { %v127_v38 = vmul.f32 %v125_v35, %v88_v12 }
 0x11a   :  { %v114_v39 = vsub.f32 1.5, %v113_v37 }
 0x11b   :  { %v132_v40 = vadd.f32 %v163_v36, %v127_v38 }
 0x11c   :  { %v115_v41 = vmul.f32 %v167_v29, %v114_v39 }
 0x11d   :  { %134 = vst [vmem:[#allocation9] sm:$0xff] %v132_v40 }
 0x11e   :  { %v119_v42 = vsel %vm118_vm5, %v167_v29, %v115_v41 }
 0x11f   :  { %v126_v43 = vmul.f32 %v162_v30, %v119_v42 }
 0x121   :  { %v128_v44 = vmul.f32 %v126_v43, %v89_v16 }
 0x123   :  { %v133_v45 = vadd.f32 %v163_v36, %v128_v44 }
 0x125   :  { %135 = vst [vmem:[#allocation9 + $0x8] sm:$0xff] %v133_v45 }
 0x126   :  { %148 = dma.vmem_to_hbm [thread:$0]  %s141_s14, 256, %s143_s17, [#allocation5], %s271_s28, %s271_s28, %s272_s29  }
 0x127   :  { %268 = dma.done.wait [#allocation5], 256  }
 0x128   :  { %269 = vsyncadd [#allocation5], 4294967040 }
 0x129   :  { %153 = vsyncpa [#allocation4], 1 }
 0x12a   :  { %154 = vsyncpa [#allocation7], 1 }
 0x12b   :  { %155 = vsyncpa [#allocation5], 1 }

</bundles_post_ra>
